<compile_context>
chip_gen: v6e
topology: v6e:2x2x1
jax: 0.10.0
libtpu: 0.0.40
codegen_flags: <defaults>
</compile_context>

<pallas_src>
import functools

import jax
import jax.numpy as jnp
from jax import lax
from jax.experimental import pallas as pl
from jax.experimental.pallas import tpu as pltpu


def _round_up(n, m):
    return ((n + m - 1) // m) * m


def _tensorcores_per_chip():
    """Best-effort TensorCores-per-chip (v7x = 2, v5e/v6e = 1)."""
    try:
        info = pltpu.get_tpu_info()
        for attr in ("tensorcores_per_chip", "num_tensorcores_per_chip",
                     "cores_per_chip"):
            v = getattr(info, attr, None)
            if isinstance(v, int) and 0 < v <= 8:
                return v
    except Exception:
        pass
    try:
        kind = jax.devices()[0].device_kind.lower()
        if "v7" in kind or "7x" in kind:
            return 2
    except Exception:
        pass
    return 1


def _mlp_kernel(x_ref, w1_ref, b1_ref, w2_ref, b2_ref, w3_ref, b3_ref,
                w4_ref, b4_ref, o_ref):
    """x [bb, F] native layout; wi [out, in] in compute dtype; bi [out, 1] f32;
    w4 [s3, 1] f32 column; out [1, bb] f32 (batch on lanes, lane-dense)."""
    cdt = w1_ref.dtype                       # MXU compute dtype (bf16 or f32)
    x = x_ref[...].astype(cdt)               # cast inside the kernel

    # Layer 1: contract the feature axis of BOTH operands -> [s1, bb]
    # (equivalent to W1 @ x^T; keeps batch on the lane axis downstream).
    h = lax.dot_general(w1_ref[...], x, (((1,), (1,)), ((), ())),
                        preferred_element_type=jnp.float32)
    h = jnp.maximum(h + b1_ref[...], 0.0)

    h = jnp.dot(w2_ref[...], h.astype(cdt), preferred_element_type=jnp.float32)
    h = jnp.maximum(h + b2_ref[...], 0.0)

    h = jnp.dot(w3_ref[...], h.astype(cdt), preferred_element_type=jnp.float32)
    h = jnp.maximum(h + b3_ref[...], 0.0)

    # Layer 4: single output unit -> weighted sublane reduce (VPU mul + XLU
    # reduce) instead of an M=1 MXU matmul.  All in f32.
    out = jnp.sum(w4_ref[...] * h, axis=0, keepdims=True) + b4_ref[...]
    o_ref[...] = out.astype(o_ref.dtype)     # lane-dense [1, bb] store


@functools.partial(jax.jit, static_argnames=("block_batch", "compute_dtype"))
def regression_nn_forward(x, params, *, block_batch=8192,
                          compute_dtype=jnp.bfloat16):
    """x: [B, 6] in its native layout (any float dtype).
    params: PyTorch-layout w1..w4 ([out, in]) and b1..b4 ([out])."""
    B, F = x.shape
    cdt = jnp.dtype(compute_dtype)
    x_bytes = x.dtype.itemsize

    s1 = params["w1"].shape[0]
    s2 = params["w2"].shape[0]
    s3 = params["w3"].shape[0]
    wmax = max(s1, s2, s3)

    # ---- batch-tile selection ------------------------------------------------
    # VMEM bytes per unit of bb: double-buffered x tile rows (minor dim F
    # lane-pads to 128 in VMEM), an in-kernel bf16 copy of the tile, the
    # double-buffered [1, bb] output tile (8-sublane pad) and a generous
    # allowance for the live [wmax, bb] f32 activations.
    per_bb_bytes = (2 * 128 * x_bytes) + (128 * 2) + (2 * 8 * 4) + (4 * wmax * 4)
    vmem_budget = 24 * 1024 * 1024           # safe under v7x's 64 MiB/TC VMEM

    bb = max(128, (min(block_batch, _round_up(B, 128)) // 128) * 128)

    # Only split the batch across grid steps on multi-TensorCore chips (v7x);
    # on single-TC v5e/v6e extra steps only add ~0.35 us/step serial overhead.
    n_cores = _tensorcores_per_chip()
    if n_cores > 1 and B >= n_cores * 1024 and pl.cdiv(B, bb) < n_cores:
        bb = max(1024, _round_up(pl.cdiv(B, n_cores), 128))

    # v7x: prefer a step count that is a multiple of the core count.
    steps = pl.cdiv(B, bb)
    if n_cores > 1 and steps > 1 and steps % n_cores:
        bb = max(128, _round_up(pl.cdiv(B, _round_up(steps, n_cores)), 128))

    # Cap against the VMEM budget.
    bb = min(bb, max(128, (vmem_budget // per_bb_bytes) // 128 * 128))
    grid = (pl.cdiv(B, bb),)

    vmem_limit = int(min(48 * 1024 * 1024,
                         max(16 * 1024 * 1024,
                             per_bb_bytes * bb * 5 // 4 + (2 << 20))))

    # ---- parameters (tiny; wrapper-side casts/reshapes are negligible) -------
    w1 = params["w1"].astype(cdt)
    w2 = params["w2"].astype(cdt)
    w3 = params["w3"].astype(cdt)
    w4 = params["w4"].reshape(-1, 1).astype(jnp.float32)      # [s3, 1] f32 col
    b1 = params["b1"].reshape(-1, 1).astype(jnp.float32)
    b2 = params["b2"].reshape(-1, 1).astype(jnp.float32)
    b3 = params["b3"].reshape(-1, 1).astype(jnp.float32)
    b4 = params["b4"].reshape(-1, 1).astype(jnp.float32)      # [1, 1]

    def full_spec(arr):
        # Entire (tiny) parameter array resident every grid step.
        return pl.BlockSpec(arr.shape, lambda i: (0,) * arr.ndim)

    param_bytes = sum(int(a.size) * a.dtype.itemsize
                      for a in (w1, b1, w2, b2, w3, b3, w4, b4))
    cost = pl.CostEstimate(
        flops=int(2 * B * (F * s1 + s1 * s2 + s2 * s3 + s3 * 1)),
        transcendentals=0,
        bytes_accessed=int(B * F * x_bytes + B * 4 + param_bytes),
    )

    out_t = pl.pallas_call(
        _mlp_kernel,
        out_shape=jax.ShapeDtypeStruct((1, B), jnp.float32),
        grid_spec=pl.GridSpec(
            grid=grid,
            in_specs=[
                pl.BlockSpec((bb, F), lambda i: (i, 0)),       # native x tile
                full_spec(w1), full_spec(b1),
                full_spec(w2), full_spec(b2),
                full_spec(w3), full_spec(b3),
                full_spec(w4), full_spec(b4),
            ],
            out_specs=pl.BlockSpec((1, bb), lambda i: (0, i)),  # lane-dense slab
        ),
        compiler_params=pltpu.CompilerParams(
            dimension_semantics=("parallel",),
            vmem_limit_bytes=vmem_limit),
        cost_estimate=cost,
    )(x, w1, b1, w2, b2, w3, b3, w4, b4)

    return out_t.T                                             # [B, 1]


def init_params(key, nn_width, input_size=6):
    """PyTorch-layout params: w [out, in], b [out]; uniform(+-1/sqrt(fan_in))."""
    size1, size2, size3 = nn_width
    dims = [(input_size, size1), (size1, size2), (size2, size3), (size3, 1)]
    params = {}
    for idx, (fan_in, fan_out) in enumerate(dims, start=1):
        key, kw, kb = jax.random.split(key, 3)
        bound = 1.0 / jnp.sqrt(float(fan_in))
        params[f"w{idx}"] = jax.random.uniform(
            kw, (fan_out, fan_in), jnp.float32, minval=-bound, maxval=bound)
        params[f"b{idx}"] = jax.random.uniform(
            kb, (fan_out,), jnp.float32, minval=-bound, maxval=bound)
    return params


def reference_forward(x, params):
    h = jnp.maximum(x @ params["w1"].T + params["b1"], 0.0)
    h = jnp.maximum(h @ params["w2"].T + params["b2"], 0.0)
    h = jnp.maximum(h @ params["w3"].T + params["b3"], 0.0)
    return h @ params["w4"].T + params["b4"]


if __name__ == "__main__":
    key = jax.random.PRNGKey(0)
    key, kx = jax.random.split(key)

    nn_width = [32, 32, 32]   # [size1, size2, size3]
    batch = 512
    x = jax.random.normal(kx, (batch, 6), jnp.float32)
    params = init_params(key, nn_width)

    ref = reference_forward(x, params)

    # f32 MXU-operand path: near-exact against the reference.
    out_f32 = jax.block_until_ready(
        regression_nn_forward(x, params, compute_dtype=jnp.float32))
    assert out_f32.shape == (batch, 1)
    assert jnp.allclose(out_f32, ref, atol=1e-4, rtol=1e-4), "f32 mismatch vs reference"

    # Default path: bf16 MXU operands, f32 accumulation / bias / ReLU / layer 4.
    out_bf16 = jax.block_until_ready(regression_nn_forward(x, params))
    assert out_bf16.shape == (batch, 1)
    assert jnp.allclose(out_bf16, ref, atol=5e-2, rtol=5e-2), "bf16 mismatch vs reference"

    # Ragged batch (not a multiple of the tile) through a multi-step grid.
    xr = jax.random.normal(jax.random.PRNGKey(1), (300, 6), jnp.float32)
    out_r = jax.block_until_ready(
        regression_nn_forward(xr, params, block_batch=128,
                              compute_dtype=jnp.float32))
    assert out_r.shape == (300, 1)
    assert jnp.allclose(out_r, reference_forward(xr, params),
                        atol=1e-4, rtol=1e-4), "ragged-batch mismatch vs reference"

    print("KERNEL_OK")
</pallas_src>

<mosaic_0001>
module attributes {stable_mosaic.version = 11 : i64} {
  func.func @_mlp_kernel(%arg0: i32, %arg1: memref<512x6xf32, #tpu.memory_space<vmem>>, %arg2: memref<32x6xf32, #tpu.memory_space<vmem>>, %arg3: memref<32x1xf32, #tpu.memory_space<vmem>>, %arg4: memref<32x32xf32, #tpu.memory_space<vmem>>, %arg5: memref<32x1xf32, #tpu.memory_space<vmem>>, %arg6: memref<32x32xf32, #tpu.memory_space<vmem>>, %arg7: memref<32x1xf32, #tpu.memory_space<vmem>>, %arg8: memref<32x1xf32, #tpu.memory_space<vmem>>, %arg9: memref<1x1xf32, #tpu.memory_space<vmem>>, %arg10: memref<1x512xf32, #tpu.memory_space<vmem>>) attributes {dimension_semantics = [#tpu.dimension_semantics<parallel>], iteration_bounds = array<i64: 1>, scalar_prefetch = 0 : i64, scratch_operands = 0 : i64, tpu.core_type = #tpu.core_type<tc>, window_params = [{transform_indices = @transform_0, window_bounds = array<i64: 512, 6>}, {pipeline_mode = #tpu.pipeline_mode<synchronous>, transform_indices = @transform_1, window_bounds = array<i64: 32, 6>}, {pipeline_mode = #tpu.pipeline_mode<synchronous>, transform_indices = @transform_2, window_bounds = array<i64: 32, 1>}, {pipeline_mode = #tpu.pipeline_mode<synchronous>, transform_indices = @transform_3, window_bounds = array<i64: 32, 32>}, {pipeline_mode = #tpu.pipeline_mode<synchronous>, transform_indices = @transform_4, window_bounds = array<i64: 32, 1>}, {pipeline_mode = #tpu.pipeline_mode<synchronous>, transform_indices = @transform_5, window_bounds = array<i64: 32, 32>}, {pipeline_mode = #tpu.pipeline_mode<synchronous>, transform_indices = @transform_6, window_bounds = array<i64: 32, 1>}, {pipeline_mode = #tpu.pipeline_mode<synchronous>, transform_indices = @transform_7, window_bounds = array<i64: 32, 1>}, {pipeline_mode = #tpu.pipeline_mode<synchronous>, transform_indices = @transform_8, window_bounds = array<i64: 1, 1>}, {transform_indices = @transform_9, window_bounds = array<i64: 1, 512>}]} {
    %c0 = arith.constant 0 : index
    %c0_0 = arith.constant 0 : index
    %0 = vector.load %arg1[%c0, %c0_0] : memref<512x6xf32, #tpu.memory_space<vmem>>, vector<512x6xf32>
    %c0_1 = arith.constant 0 : index
    %c0_2 = arith.constant 0 : index
    %1 = vector.load %arg2[%c0_1, %c0_2] : memref<32x6xf32, #tpu.memory_space<vmem>>, vector<32x6xf32>
    %cst = arith.constant dense<0.000000e+00> : vector<32x512xf32>
    %2 = tpu.matmul %1, %0, %cst {dimension_numbers = #tpu.dot_dimension_numbers<[1], [1], [0], [0], [0, 0, 1, 0], [], []>} : vector<32x6xf32>, vector<512x6xf32>, vector<32x512xf32> -> vector<32x512xf32>
    %c0_3 = arith.constant 0 : index
    %c0_4 = arith.constant 0 : index
    %3 = vector.load %arg3[%c0_3, %c0_4] : memref<32x1xf32, #tpu.memory_space<vmem>>, vector<32x1xf32>
    %4 = vector.broadcast %3 : vector<32x1xf32> to vector<32x512xf32>
    %5 = arith.addf %2, %4 : vector<32x512xf32>
    %cst_5 = arith.constant 0.000000e+00 : f32
    %6 = vector.broadcast %cst_5 : f32 to vector<32x512xf32>
    %7 = arith.maximumf %5, %6 : vector<32x512xf32>
    %c0_6 = arith.constant 0 : index
    %c0_7 = arith.constant 0 : index
    %8 = vector.load %arg4[%c0_6, %c0_7] : memref<32x32xf32, #tpu.memory_space<vmem>>, vector<32x32xf32>
    %cst_8 = arith.constant dense<0.000000e+00> : vector<32x512xf32>
    %9 = tpu.matmul %8, %7, %cst_8 {dimension_numbers = #tpu.dot_dimension_numbers<[1], [0], [0], [1], [0, 0, 1, 1], [], []>} : vector<32x32xf32>, vector<32x512xf32>, vector<32x512xf32> -> vector<32x512xf32>
    %c0_9 = arith.constant 0 : index
    %c0_10 = arith.constant 0 : index
    %10 = vector.load %arg5[%c0_9, %c0_10] : memref<32x1xf32, #tpu.memory_space<vmem>>, vector<32x1xf32>
    %11 = vector.broadcast %10 : vector<32x1xf32> to vector<32x512xf32>
    %12 = arith.addf %9, %11 : vector<32x512xf32>
    %cst_11 = arith.constant 0.000000e+00 : f32
    %13 = vector.broadcast %cst_11 : f32 to vector<32x512xf32>
    %14 = arith.maximumf %12, %13 : vector<32x512xf32>
    %c0_12 = arith.constant 0 : index
    %c0_13 = arith.constant 0 : index
    %15 = vector.load %arg6[%c0_12, %c0_13] : memref<32x32xf32, #tpu.memory_space<vmem>>, vector<32x32xf32>
    %cst_14 = arith.constant dense<0.000000e+00> : vector<32x512xf32>
    %16 = tpu.matmul %15, %14, %cst_14 {dimension_numbers = #tpu.dot_dimension_numbers<[1], [0], [0], [1], [0, 0, 1, 1], [], []>} : vector<32x32xf32>, vector<32x512xf32>, vector<32x512xf32> -> vector<32x512xf32>
    %c0_15 = arith.constant 0 : index
    %c0_16 = arith.constant 0 : index
    %17 = vector.load %arg7[%c0_15, %c0_16] : memref<32x1xf32, #tpu.memory_space<vmem>>, vector<32x1xf32>
    %18 = vector.broadcast %17 : vector<32x1xf32> to vector<32x512xf32>
    %19 = arith.addf %16, %18 : vector<32x512xf32>
    %cst_17 = arith.constant 0.000000e+00 : f32
    %20 = vector.broadcast %cst_17 : f32 to vector<32x512xf32>
    %21 = arith.maximumf %19, %20 : vector<32x512xf32>
    %c0_18 = arith.constant 0 : index
    %c0_19 = arith.constant 0 : index
    %22 = vector.load %arg8[%c0_18, %c0_19] : memref<32x1xf32, #tpu.memory_space<vmem>>, vector<32x1xf32>
    %23 = vector.broadcast %22 : vector<32x1xf32> to vector<32x512xf32>
    %24 = arith.mulf %23, %21 : vector<32x512xf32>
    %cst_20 = arith.constant dense<0.000000e+00> : vector<512xf32>
    %25 = vector.multi_reduction <add>, %24, %cst_20 [0] : vector<32x512xf32> to vector<512xf32>
    %26 = vector.shape_cast %25 : vector<512xf32> to vector<1x512xf32>
    %c0_21 = arith.constant 0 : index
    %c0_22 = arith.constant 0 : index
    %27 = vector.load %arg9[%c0_21, %c0_22] : memref<1x1xf32, #tpu.memory_space<vmem>>, vector<1x1xf32>
    %28 = vector.broadcast %27 : vector<1x1xf32> to vector<1x512xf32>
    %29 = arith.addf %26, %28 : vector<1x512xf32>
    %c0_23 = arith.constant 0 : index
    %c0_24 = arith.constant 0 : index
    %30 = vector.load %arg10[%c0_23, %c0_24] : memref<1x512xf32, #tpu.memory_space<vmem>>, vector<1x512xf32>
    tpu.vector_store %arg10[%c0_23, %c0_24], %29 {strides = array<i32>} : memref<1x512xf32, #tpu.memory_space<vmem>>, vector<1x512xf32>,
    return
  }
  func.func @transform_0(%arg0: i32) -> (i32, i32) {
    %c0_i32 = arith.constant 0 : i32
    %c0_i32_0 = arith.constant 0 : i32
    return %arg0, %c0_i32 : i32, i32
  }
  func.func @transform_1(%arg0: i32) -> (i32, i32) {
    %c0_i32 = arith.constant 0 : i32
    %c0_i32_0 = arith.constant 0 : i32
    %c0_i32_1 = arith.constant 0 : i32
    return %c0_i32, %c0_i32_0 : i32, i32
  }
  func.func @transform_2(%arg0: i32) -> (i32, i32) {
    %c0_i32 = arith.constant 0 : i32
    %c0_i32_0 = arith.constant 0 : i32
    %c0_i32_1 = arith.constant 0 : i32
    return %c0_i32, %c0_i32_0 : i32, i32
  }
  func.func @transform_3(%arg0: i32) -> (i32, i32) {
    %c0_i32 = arith.constant 0 : i32
    %c0_i32_0 = arith.constant 0 : i32
    %c0_i32_1 = arith.constant 0 : i32
    return %c0_i32, %c0_i32_0 : i32, i32
  }
  func.func @transform_4(%arg0: i32) -> (i32, i32) {
    %c0_i32 = arith.constant 0 : i32
    %c0_i32_0 = arith.constant 0 : i32
    %c0_i32_1 = arith.constant 0 : i32
    return %c0_i32, %c0_i32_0 : i32, i32
  }
  func.func @transform_5(%arg0: i32) -> (i32, i32) {
    %c0_i32 = arith.constant 0 : i32
    %c0_i32_0 = arith.constant 0 : i32
    %c0_i32_1 = arith.constant 0 : i32
    return %c0_i32, %c0_i32_0 : i32, i32
  }
  func.func @transform_6(%arg0: i32) -> (i32, i32) {
    %c0_i32 = arith.constant 0 : i32
    %c0_i32_0 = arith.constant 0 : i32
    %c0_i32_1 = arith.constant 0 : i32
    return %c0_i32, %c0_i32_0 : i32, i32
  }
  func.func @transform_7(%arg0: i32) -> (i32, i32) {
    %c0_i32 = arith.constant 0 : i32
    %c0_i32_0 = arith.constant 0 : i32
    %c0_i32_1 = arith.constant 0 : i32
    return %c0_i32, %c0_i32_0 : i32, i32
  }
  func.func @transform_8(%arg0: i32) -> (i32, i32) {
    %c0_i32 = arith.constant 0 : i32
    %c0_i32_0 = arith.constant 0 : i32
    %c0_i32_1 = arith.constant 0 : i32
    return %c0_i32, %c0_i32_0 : i32, i32
  }
  func.func @transform_9(%arg0: i32) -> (i32, i32) {
    %c0_i32 = arith.constant 0 : i32
    %c0_i32_0 = arith.constant 0 : i32
    return %c0_i32, %arg0 : i32, i32
  }
}

</mosaic_0001>

<bundles_post_ra>
// kernel: regression_nn_forward.1
= control target key start
LH: loop header
LB: loop body
LE: loop exit
PB: predicated region body
PF: predicated region fallthrough
CT: control target
= control target key end

     0   :  { %s1783_s0 = inlined_call_operand.vmem [shape: f32[512,6], index: 0, kind: input, shape index: {}]   ;;  %s1784_s1 = inlined_call_operand.vmem [shape: f32[32,6], index: 1, kind: input, shape index: {}]   ;;  %s1785_s2 = inlined_call_operand.vmem [shape: f32[32,1], index: 2, kind: input, shape index: {}]   ;;  %s1786_s3 = inlined_call_operand.vmem [shape: f32[32,32], index: 3, kind: input, shape index: {}]   ;;  %s1787_s4 = inlined_call_operand.vmem [shape: f32[32,1], index: 4, kind: input, shape index: {}]   ;;  %s1788_s5 = inlined_call_operand.vmem [shape: f32[32,32], index: 5, kind: input, shape index: {}]   ;;  %s1789_s6 = inlined_call_operand.vmem [shape: f32[32,1], index: 6, kind: input, shape index: {}]   ;;  %s1790_s7 = inlined_call_operand.vmem [shape: f32[32,1], index: 7, kind: input, shape index: {}]   ;;  %s1791_s8 = inlined_call_operand.<no memory space> [shape: f32[1,1], index: 8, kind: input, shape index: {}]   ;;  %s1792_s9 = inlined_call_operand.hbm [shape: f32[1,512], index: 9, kind: output, shape index: {}]  }
   0x1   :  { %v14_v0 = vstv %s1791_s8 }
   0x2   :  { %15 = vst [vmem:[#allocation2] sm:$0x1] %v14_v0 }
   0x3   :  { %v66_v1 = vld [vmem:[%s1783_s0 + $0xf8] sm:$0xff]  ;;  %vm127_vm0 = vcmask 48128   ;;  %v65_v5 = vld [vmem:[%s1783_s0 + $0xf0] sm:$0xff]  ;;  %v64_v9 = vld [vmem:[%s1783_s0 + $0xe8] sm:$0xff]  ;;  %v1329_v11 = vmov 0  }
   0x4   :  { %v98_v2 = vld [vmem:[%s1783_s0 + $0x1f8] sm:$0xff]  ;;  %1221 = vmatprep.subr.msk.mxu0 %vm127_vm0, %v66_v1  ;;  %v97_v6 = vld [vmem:[%s1783_s0 + $0x1f0] sm:$0xff]  ;;  %v96_v10 = vld [vmem:[%s1783_s0 + $0x1e8] sm:$0xff]  ;;  %1305 = vset.pattern.permute.xlu0 %v1329_v11 }
   0x5   :  { %v50_v3 = vld [vmem:[%s1783_s0 + $0x78] sm:$0xff]  ;;  %1261 = vmatprep.subr.msk.mxu1 %vm127_vm0, %v98_v2  ;;  %v49_v7 = vld [vmem:[%s1783_s0 + $0x70] sm:$0xff]  ;;  %1306 = vset.pattern.permute.xlu1 %v1329_v11  ;;  %v48_v12 = vld [vmem:[%s1783_s0 + $0x68] sm:$0xff] }
   0x6   :  { %v82_v4 = vld [vmem:[%s1783_s0 + $0x178] sm:$0xff]  ;;  %1222 = vmatpush3.xpose.msk.msra.mxu0 %vm127_vm0, %v50_v3  ;;  %v81_v8 = vld [vmem:[%s1783_s0 + $0x170] sm:$0xff]  ;;  %v80_v13 = vld [vmem:[%s1783_s0 + $0x168] sm:$0xff] }
   0x7   :  { %1262 = vmatpush3.xpose.msk.msra.mxu1 %vm127_vm0, %v82_v4  ;;  %1223 = vmatprep.subr.msk.mxu0 %vm127_vm0, %v65_v5  ;;  %v63_v14 = vld [vmem:[%s1783_s0 + $0xe0] sm:$0xff]  ;;  %v62_v18 = vld [vmem:[%s1783_s0 + $0xd8] sm:$0xff]  ;;  %v61_v22 = vld [vmem:[%s1783_s0 + $0xd0] sm:$0xff] }
   0x8   :  { %1263 = vmatprep.subr.msk.mxu1 %vm127_vm0, %v97_v6  ;;  %v95_v15 = vld [vmem:[%s1783_s0 + $0x1e0] sm:$0xff]  ;;  %v94_v19 = vld [vmem:[%s1783_s0 + $0x1d8] sm:$0xff]  ;;  %v93_v23 = vld [vmem:[%s1783_s0 + $0x1d0] sm:$0xff] }
   0x9   :  { %v47_v16 = vld [vmem:[%s1783_s0 + $0x60] sm:$0xff]  ;;  %v46_v20 = vld [vmem:[%s1783_s0 + $0x58] sm:$0xff]  ;;  %v45_v24 = vld [vmem:[%s1783_s0 + $0x50] sm:$0xff] }
   0xa   :  { %1224 = vmatpush3.xpose.msk.msra.mxu0 %vm127_vm0, %v49_v7  ;;  %v79_v17 = vld [vmem:[%s1783_s0 + $0x160] sm:$0xff]  ;;  %v78_v21 = vld [vmem:[%s1783_s0 + $0x158] sm:$0xff]  ;;  %v77_v25 = vld [vmem:[%s1783_s0 + $0x150] sm:$0xff] }
   0xb   :  { %1264 = vmatpush3.xpose.msk.msra.mxu1 %vm127_vm0, %v81_v8  ;;  %1225 = vmatprep.subr.msk.mxu0 %vm127_vm0, %v64_v9  ;;  %v60_v26 = vld [vmem:[%s1783_s0 + $0xc8] sm:$0xff]  ;;  %v1489_v28 = vld [vmem:[%s1784_s1] sm:$0xff]  ;;  %v106_v29 = vld [vmem:[%s1785_s2 + $0x18] sm:$0xff] }
   0xc   :  { %1265 = vmatprep.subr.msk.mxu1 %vm127_vm0, %v96_v10  ;;  %v92_v27 = vld [vmem:[%s1783_s0 + $0x1c8] sm:$0xff]  ;;  %v59_v33 = vld [vmem:[%s1783_s0 + $0xc0] sm:$0xff]  ;;  %1253 = vmatprep.mubr.msk.f32.mxu0 %vm127_vm0, %v1489_v28  ;;  %v105_v35 = vld [vmem:[%s1785_s2 + $0x10] sm:$0xff] }
   0xd   :  { %v44_v30 = vld [vmem:[%s1783_s0 + $0x48] sm:$0xff]  ;;  %v91_v34 = vld [vmem:[%s1783_s0 + $0x1c0] sm:$0xff]  ;;  %1293 = vmatprep.mubr.msk.f32.mxu1 %vm127_vm0, %v1489_v28  ;;  %124 = vperm.xlu0 %1305, %v106_v29   ;;  %v58_v39 = vld [vmem:[%s1783_s0 + $0xb8] sm:$0xff] }
   0xe   :  { %1226 = vmatpush3.xpose.msk.msra.mxu0 %vm127_vm0, %v48_v12  ;;  %v76_v31 = vld [vmem:[%s1783_s0 + $0x148] sm:$0xff]  ;;  %v103_v36 = vld [vmem:[%s1785_s2] sm:$0xff]  ;;  %v90_v40 = vld [vmem:[%s1783_s0 + $0x1b8] sm:$0xff] }
   0xf   :  { %1266 = vmatpush3.xpose.msk.msra.mxu1 %vm127_vm0, %v80_v13  ;;  %1227 = vmatprep.subr.msk.mxu0 %vm127_vm0, %v63_v14  ;;  %v104_v32 = vld [vmem:[%s1785_s2 + $0x8] sm:$0xff]  ;;  %v43_v37 = vld [vmem:[%s1783_s0 + $0x40] sm:$0xff] }
  0x10   :  { %1267 = vmatprep.subr.msk.mxu1 %vm127_vm0, %v95_v15  ;;  %114 = vperm.xlu1 %1306, %v104_v32   ;;  %v75_v38 = vld [vmem:[%s1783_s0 + $0x140] sm:$0xff] }
  0x12   :  { %1228 = vmatpush3.xpose.msk.msra.mxu0 %vm127_vm0, %v47_v16 }
  0x13   :  { %1268 = vmatpush3.xpose.msk.msra.mxu1 %vm127_vm0, %v79_v17  ;;  %1229 = vmatprep.subr.msk.mxu0 %vm127_vm0, %v62_v18 }
  0x14   :  { %1269 = vmatprep.subr.msk.mxu1 %vm127_vm0, %v94_v19 }
  0x16   :  { %1230 = vmatpush3.xpose.msk.msra.mxu0 %vm127_vm0, %v46_v20 }
  0x17   :  { %1270 = vmatpush3.xpose.msk.msra.mxu1 %vm127_vm0, %v78_v21  ;;  %1231 = vmatprep.subr.msk.mxu0 %vm127_vm0, %v61_v22 }
  0x18   :  { %1271 = vmatprep.subr.msk.mxu1 %vm127_vm0, %v93_v23 }
  0x1a   :  { %1232 = vmatpush3.xpose.msk.msra.mxu0 %vm127_vm0, %v45_v24 }
  0x1b   :  { %1272 = vmatpush3.xpose.msk.msra.mxu1 %vm127_vm0, %v77_v25  ;;  %1233 = vmatprep.subr.msk.mxu0 %vm127_vm0, %v60_v26 }
  0x1c   :  { %1273 = vmatprep.subr.msk.mxu1 %vm127_vm0, %v92_v27 }
  0x1e   :  { %1234 = vmatpush3.xpose.msk.msra.mxu0 %vm127_vm0, %v44_v30 }
  0x1f   :  { %1274 = vmatpush3.xpose.msk.msra.mxu1 %vm127_vm0, %v76_v31  ;;  %1235 = vmatprep.subr.msk.mxu0 %vm127_vm0, %v59_v33 }
  0x20   :  { %1275 = vmatprep.subr.msk.mxu1 %vm127_vm0, %v91_v34 }
  0x21   :  { %16 = vsyncpa [#allocation4], 0  ;;  %119 = vperm.xlu0 %1305, %v105_v35   ;;  %109 = vperm.xlu1 %1306, %v103_v36   ;;  %v533_v41 = vld [vmem:[%s1787_s4 + $0x18] sm:$0xff]  ;;  %v532_v42 = vld [vmem:[%s1787_s4 + $0x10] sm:$0xff]  ;;  %v1330_v23 = vmov 0.0   ;;  %vm554_vm1 = vcmask 261120  }
  0x22   :  { %1236 = vmatpush3.xpose.msk.msra.mxu0 %vm127_vm0, %v43_v37  ;;  %v42_v43 = vld [vmem:[%s1783_s0 + $0x38] sm:$0xff]  ;;  %v57_v45 = vld [vmem:[%s1783_s0 + $0xb0] sm:$0xff]  ;;  %v531_v47 = vld [vmem:[%s1787_s4 + $0x8] sm:$0xff] }
  0x23   :  { %1276 = vmatpush3.xpose.msk.msra.mxu1 %vm127_vm0, %v75_v38  ;;  %1237 = vmatprep.subr.msk.mxu0 %vm127_vm0, %v58_v39  ;;  %v74_v44 = vld [vmem:[%s1783_s0 + $0x138] sm:$0xff]  ;;  %v89_v46 = vld [vmem:[%s1783_s0 + $0x1b0] sm:$0xff]  ;;  %v530_v48 = vld [vmem:[%s1787_s4] sm:$0xff] }
  0x24   :  { %1277 = vmatprep.subr.msk.mxu1 %vm127_vm0, %v90_v40  ;;  %v41_v49 = vld [vmem:[%s1783_s0 + $0x30] sm:$0xff]  ;;  %v56_v51 = vld [vmem:[%s1783_s0 + $0xa8] sm:$0xff]  ;;  %v765_v53 = vld [vmem:[%s1789_s6] sm:$0xff] }
  0x25   :  { %551 = vperm.xlu0 %1305, %v533_v41   ;;  %546 = vperm.xlu1 %1306, %v532_v42   ;;  %v73_v50 = vld [vmem:[%s1783_s0 + $0x130] sm:$0xff]  ;;  %v88_v52 = vld [vmem:[%s1783_s0 + $0x1a8] sm:$0xff]  ;;  %v55_v57 = vld [vmem:[%s1783_s0 + $0xa0] sm:$0xff] }
  0x26   :  { %1238 = vmatpush3.xpose.msk.msra.mxu0 %vm127_vm0, %v42_v43  ;;  %v766_v54 = vld [vmem:[%s1789_s6 + $0x8] sm:$0xff]  ;;  %v87_v58 = vld [vmem:[%s1783_s0 + $0x1a0] sm:$0xff]  ;;  %v767_v59 = vld [vmem:[%s1789_s6 + $0x10] sm:$0xff] }
  0x27   :  { %1278 = vmatpush3.xpose.msk.msra.mxu1 %vm127_vm0, %v74_v44  ;;  %1239 = vmatprep.subr.msk.mxu0 %vm127_vm0, %v57_v45  ;;  %v40_v55 = vld [vmem:[%s1783_s0 + $0x28] sm:$0xff]  ;;  %v768_v60 = vld [vmem:[%s1789_s6 + $0x18] sm:$0xff]  ;;  %v39_v61 = vld [vmem:[%s1783_s0 + $0x20] sm:$0xff] }
  0x28   :  { %1279 = vmatprep.subr.msk.mxu1 %vm127_vm0, %v89_v46  ;;  %v72_v56 = vld [vmem:[%s1783_s0 + $0x128] sm:$0xff]  ;;  %v71_v62 = vld [vmem:[%s1783_s0 + $0x120] sm:$0xff]  ;;  %v54_v63 = vld [vmem:[%s1783_s0 + $0x98] sm:$0xff] }
  0x29   :  { %541 = vperm.xlu0 %1305, %v531_v47   ;;  %536 = vperm.xlu1 %1306, %v530_v48   ;;  %v86_v0 = vld [vmem:[%s1783_s0 + $0x198] sm:$0xff]  ;;  %v995_v1 = vld [vmem:[%s1790_s7] sm:$0xff]  ;;  %v996_v2 = vld [vmem:[%s1790_s7 + $0x8] sm:$0xff] }
  0x2a   :  { %1240 = vmatpush3.xpose.msk.msra.mxu0 %vm127_vm0, %v41_v49  ;;  %v38_v3 = vld [vmem:[%s1783_s0 + $0x18] sm:$0xff]  ;;  %v53_v5 = vld [vmem:[%s1783_s0 + $0x90] sm:$0xff]  ;;  %v52_v11 = vld [vmem:[%s1783_s0 + $0x88] sm:$0xff] }
  0x2b   :  { %1280 = vmatpush3.xpose.msk.msra.mxu1 %vm127_vm0, %v73_v50  ;;  %1241 = vmatprep.subr.msk.mxu0 %vm127_vm0, %v56_v51  ;;  %v70_v4 = vld [vmem:[%s1783_s0 + $0x118] sm:$0xff]  ;;  %v85_v6 = vld [vmem:[%s1783_s0 + $0x190] sm:$0xff]  ;;  %v84_v12 = vld [vmem:[%s1783_s0 + $0x188] sm:$0xff] }
  0x2c   :  { %1281 = vmatprep.subr.msk.mxu1 %vm127_vm0, %v88_v52  ;;  %v997_v7 = vld [vmem:[%s1790_s7 + $0x10] sm:$0xff]  ;;  %v998_v8 = vld [vmem:[%s1790_s7 + $0x18] sm:$0xff]  ;;  %v1071_v13 = vld [vmem:[#allocation2] sm:$0x1] }
  0x2d   :  { %771 = vperm.xlu0 %1305, %v765_v53   ;;  %776 = vperm.xlu1 %1306, %v766_v54   ;;  %v37_v9 = vld [vmem:[%s1783_s0 + $0x10] sm:$0xff]  ;;  %v36_v14 = vld [vmem:[%s1783_s0 + $0x8] sm:$0xff]  ;;  %v51_v16 = vld [vmem:[%s1783_s0 + $0x80] sm:$0xff] }
  0x2e   :  { %1242 = vmatpush3.xpose.msk.msra.mxu0 %vm127_vm0, %v40_v55  ;;  %v69_v10 = vld [vmem:[%s1783_s0 + $0x110] sm:$0xff]  ;;  %v68_v15 = vld [vmem:[%s1783_s0 + $0x108] sm:$0xff]  ;;  %v83_v17 = vld [vmem:[%s1783_s0 + $0x180] sm:$0xff] }
  0x2f   :  { %1282 = vmatpush3.xpose.msk.msra.mxu1 %vm127_vm0, %v72_v56  ;;  %1243 = vmatprep.subr.msk.mxu0 %vm127_vm0, %v55_v57  ;;  %v35_v18 = vld [vmem:[%s1783_s0] sm:$0xff]  ;;  %v100_v20 = vld [vmem:[%s1784_s1 + $0x8] sm:$0xff]  ;;  %v101_v21 = vld [vmem:[%s1784_s1 + $0x10] sm:$0xff] }
  0x30   :  { %1283 = vmatprep.subr.msk.mxu1 %vm127_vm0, %v87_v58  ;;  %v67_v19 = vld [vmem:[%s1783_s0 + $0x100] sm:$0xff]  ;;  %v102_v22 = vld [vmem:[%s1784_s1 + $0x18] sm:$0xff] }
  0x31   :  { %781 = vperm.xlu0 %1305, %v767_v59   ;;  %786 = vperm.xlu1 %1306, %v768_v60  }
  0x32   :  { %1244 = vmatpush3.xpose.msk.msra.mxu0 %vm127_vm0, %v39_v61 }
  0x33   :  { %1284 = vmatpush3.xpose.msk.msra.mxu1 %vm127_vm0, %v71_v62  ;;  %1245 = vmatprep.subr.msk.mxu0 %vm127_vm0, %v54_v63 }
  0x34   :  { %1285 = vmatprep.subr.msk.mxu1 %vm127_vm0, %v86_v0 }
  0x35   :  { %1001 = vperm.xlu0 %1305, %v995_v1   ;;  %1006 = vperm.xlu1 %1306, %v996_v2  }
  0x36   :  { %1246 = vmatpush3.xpose.msk.msra.mxu0 %vm127_vm0, %v38_v3 }
  0x37   :  { %1286 = vmatpush3.xpose.msk.msra.mxu1 %vm127_vm0, %v70_v4  ;;  %1247 = vmatprep.subr.msk.mxu0 %vm127_vm0, %v53_v5 }
  0x38   :  { %1287 = vmatprep.subr.msk.mxu1 %vm127_vm0, %v85_v6 }
  0x39   :  { %1011 = vperm.xlu0 %1305, %v997_v7   ;;  %1016 = vperm.xlu1 %1306, %v998_v8  }
  0x3a   :  { %1248 = vmatpush3.xpose.msk.msra.mxu0 %vm127_vm0, %v37_v9 }
  0x3b   :  { %1288 = vmatpush3.xpose.msk.msra.mxu1 %vm127_vm0, %v69_v10  ;;  %1249 = vmatprep.subr.msk.mxu0 %vm127_vm0, %v52_v11 }
  0x3c   :  { %1289 = vmatprep.subr.msk.mxu1 %vm127_vm0, %v84_v12  ;;  %v526_v12 = vld [vmem:[%s1786_s3] sm:$0xff] }
  0x3d   :  { %1074 = vperm.xlu0 %1305, %v1071_v13   ;;  %v527_v13 = vld [vmem:[%s1786_s3 + $0x8] sm:$0xff] }
  0x3e   :  { %1250 = vmatpush3.xpose.msk.msra.mxu0 %vm127_vm0, %v36_v14  ;;  %v528_v14 = vld [vmem:[%s1786_s3 + $0x10] sm:$0xff] }
  0x3f   :  { %1290 = vmatpush3.xpose.msk.msra.mxu1 %vm127_vm0, %v68_v15  ;;  %1251 = vmatprep.subr.msk.mxu0 %vm127_vm0, %v51_v16  ;;  %v529_v15 = vld [vmem:[%s1786_s3 + $0x18] sm:$0xff] }
  0x40   :  { %1291 = vmatprep.subr.msk.mxu1 %vm127_vm0, %v83_v17 }
  0x42   :  { %1252 = vmatpush3.xpose.msk.msra.mxu0 %vm127_vm0, %v35_v18 }
  0x43   :  { %1292 = vmatpush3.xpose.msk.msra.mxu1 %vm127_vm0, %v67_v19 }
  0x45   :  { %1254 = vmatmul.mubr.msk.f32.vlgmr.msra.gmra.mxu0 %vm127_vm0, %v1489_v28 }
  0x46   :  { %1294 = vmatmul.mubr.msk.f32.vlgmr.msra.gmra.mxu1 %vm127_vm0, %v1489_v28  ;;  %1255 = vmatprep.mubr.msk.f32.mxu0 %vm127_vm0, %v100_v20 }
  0x47   :  { %1295 = vmatprep.mubr.msk.f32.mxu1 %vm127_vm0, %v100_v20 }
  0x49   :  { %1256 = vmatmul.mubr.msk.f32.gmra.mxu0 %vm127_vm0, %v100_v20 }
  0x4a   :  { %1296 = vmatmul.mubr.msk.f32.gmra.mxu1 %vm127_vm0, %v100_v20  ;;  %1257 = vmatprep.mubr.msk.f32.mxu0 %vm127_vm0, %v101_v21 }
  0x4b   :  { %1297 = vmatprep.mubr.msk.f32.mxu1 %vm127_vm0, %v101_v21 }
  0x4d   :  { %1258 = vmatmul.mubr.msk.f32.gmra.mxu0 %vm127_vm0, %v101_v21 }
  0x4e   :  { %1298 = vmatmul.mubr.msk.f32.gmra.mxu1 %vm127_vm0, %v101_v21  ;;  %1259 = vmatprep.mubr.msk.f32.mxu0 %vm127_vm0, %v102_v22 }
  0x4f   :  { %1299 = vmatprep.mubr.msk.f32.mxu1 %vm127_vm0, %v102_v22 }
  0x51   :  { %1260 = vmatmul.mubr.msk.f32.gmra.mxu0 %vm127_vm0, %v102_v22 }
  0x52   :  { %1300 = vmatmul.mubr.msk.f32.gmra.mxu1 %vm127_vm0, %v102_v22  ;;  %631 = vmatprep.mubr.f32.mxu0 %v1330_v23 }
  0x53   :  { %720 = vmatprep.mubr.f32.mxu1 %v1330_v23 }
  0x88   :  { %v125_v32 = vpop.permute.xlu0 %124 }
  0x8b   :  { %v115_v37 = vpop.permute.xlu1 %114 }
  0x9c   :  { %v120_v40 = vpop.permute.xlu0 %119  ;;  %v110_v55 = vpop.permute.xlu1 %109 }
 0x105   :  { %v398_v24 = vpop.f32.mrf.mxu0 }
 0x106   :  { %v487_v25 = vpop.f32.mrf.mxu1  ;;  %v399_v0 = vadd.f32 %v398_v24, %v110_v55 }
 0x107   :  { %v400_v26 = vpop.f32.mrf.mxu0  ;;  %v488_v1 = vadd.f32 %v487_v25, %v110_v55 }
 0x108   :  { %v489_v27 = vpop.f32.mrf.mxu1  ;;  %v401_v60 = vadd.f32 %v400_v26, %v110_v55  ;;  %v510_v10 = vmax.f32 %v399_v0, 0.0 }
 0x109   :  { %v404_v28 = vpop.f32.mrf.mxu0  ;;  %v490_v61 = vadd.f32 %v489_v27, %v110_v55  ;;  %v512_v11 = vmax.f32 %v488_v1, 0.0  ;;  %v552_v27 = vpop.permute.xlu0 %551 }
 0x10a   :  { %v493_v29 = vpop.f32.mrf.mxu1  ;;  %v405_v56 = vadd.f32 %v404_v28, %v115_v37  ;;  %v511_v8 = vmax.f32 %v401_v60, 0.0 }
 0x10b   :  { %v406_v30 = vpop.f32.mrf.mxu0  ;;  %v494_v57 = vadd.f32 %v493_v29, %v115_v37  ;;  %v513_v9 = vmax.f32 %v490_v61, 0.0 }
 0x10c   :  { %v495_v31 = vpop.f32.mrf.mxu1  ;;  %v407_v51 = vadd.f32 %v406_v30, %v115_v37  ;;  %v514_v6 = vmax.f32 %v405_v56, 0.0  ;;  %v547_v30 = vpop.permute.xlu1 %546 }
 0x10d   :  { %v410_v33 = vpop.f32.mrf.mxu0  ;;  %v496_v52 = vadd.f32 %v495_v31, %v115_v37  ;;  %v516_v7 = vmax.f32 %v494_v57, 0.0 }
 0x10e   :  { %v499_v34 = vpop.f32.mrf.mxu1  ;;  %v411_v49 = vadd.f32 %v410_v33, %v120_v40  ;;  %v515_v4 = vmax.f32 %v407_v51, 0.0 }
 0x10f   :  { %v412_v35 = vpop.f32.mrf.mxu0  ;;  %v500_v50 = vadd.f32 %v499_v34, %v120_v40  ;;  %v517_v5 = vmax.f32 %v496_v52, 0.0 }
 0x110   :  { %v501_v36 = vpop.f32.mrf.mxu1  ;;  %v413_v45 = vadd.f32 %v412_v35, %v120_v40  ;;  %v518_v2 = vmax.f32 %v411_v49, 0.0 }
 0x111   :  { %v416_v38 = vpop.f32.mrf.mxu0  ;;  %v502_v46 = vadd.f32 %v501_v36, %v120_v40  ;;  %v520_v3 = vmax.f32 %v500_v50, 0.0 }
 0x112   :  { %v505_v39 = vpop.f32.mrf.mxu1  ;;  %v417_v41 = vadd.f32 %v416_v38, %v125_v32  ;;  %v519_v62 = vmax.f32 %v413_v45, 0.0 }
 0x113   :  { %v506_v42 = vadd.f32 %v505_v39, %v125_v32  ;;  %v418_v43 = vpop.f32.mrf.mxu0  ;;  %v521_v63 = vmax.f32 %v502_v46, 0.0 }
 0x114   :  { %v507_v44 = vpop.f32.mrf.mxu1  ;;  %v419_v47 = vadd.f32 %v418_v43, %v125_v32  ;;  %v522_v58 = vmax.f32 %v417_v41, 0.0  ;;  %v542_v41 = vpop.permute.xlu0 %541 }
 0x115   :  { %v508_v48 = vadd.f32 %v507_v44, %v125_v32  ;;  %v524_v59 = vmax.f32 %v506_v42, 0.0 }
 0x116   :  { %v523_v53 = vmax.f32 %v419_v47, 0.0 }
 0x117   :  { %v525_v54 = vmax.f32 %v508_v48, 0.0  ;;  %v537_v48 = vpop.permute.xlu1 %536 }
 0x118   :  { %591 = vmatprep.subr.mxu0 %v523_v53 }
 0x119   :  { %680 = vmatprep.subr.mxu1 %v525_v54  ;;  %592 = vmatpush1.msra.mxu0 %v522_v58 }
 0x11a   :  { %681 = vmatpush1.msra.mxu1 %v524_v59  ;;  %593 = vmatprep.subr.mxu0 %v519_v62 }
 0x11b   :  { %682 = vmatprep.subr.mxu1 %v521_v63  ;;  %594 = vmatpush1.msra.mxu0 %v518_v2 }
 0x11c   :  { %683 = vmatpush1.msra.mxu1 %v520_v3  ;;  %595 = vmatprep.subr.mxu0 %v515_v4 }
 0x11d   :  { %684 = vmatprep.subr.mxu1 %v517_v5  ;;  %596 = vmatpush1.msra.mxu0 %v514_v6  ;;  %v761_v5 = vld [vmem:[%s1788_s5] sm:$0xff]  ;;  %v762_v6 = vld [vmem:[%s1788_s5 + $0x8] sm:$0xff] }
 0x11e   :  { %685 = vmatpush1.msra.mxu1 %v516_v7  ;;  %597 = vmatprep.subr.mxu0 %v511_v8  ;;  %v763_v7 = vld [vmem:[%s1788_s5 + $0x10] sm:$0xff]  ;;  %v764_v8 = vld [vmem:[%s1788_s5 + $0x18] sm:$0xff]  ;;  %s1332_s5 = smov [#allocation3]  }
 0x11f   :  { %686 = vmatprep.subr.mxu1 %v513_v9  ;;  %598 = vmatpush1.msra.mxu0 %v510_v10  ;;  %v772_v9 = vpop.permute.xlu0 %771  ;;  %v777_v10 = vpop.permute.xlu1 %776  ;;  %s1125_s23 = sshll.u32 %s1332_s5, 4  ;;  %s1126_s23 = int_to_ptr.vmem [resolvable:$true] %s1125_s23 }
 0x120   :  { %687 = vmatpush1.msra.mxu1 %v512_v11  ;;  %1205 = vmatmul.mubr.msk.f32.vlgmr.msra.gmra.mxu0 %vm554_vm1, %v526_v12  ;;  %s1307_s24 = scalar_lea.vmem %s1126_s23, 64  ;;  %p1312_p1 = scmp.lt.s32.totalorder %s1126_s23, %s1126_s23 }
 0x121   :  { %1209 = vmatmul.mubr.msk.f32.vlgmr.msra.gmra.mxu1 %vm554_vm1, %v526_v12  ;;  %637 = vmatprep.mubr.f32.mxu0 %v1330_v23  ;;  %p1308_p0 = scmp.ne.s32.totalorder %s1126_s23, %s1307_s24  ;;  %p1313_p2 = scmp.lt.s32.totalorder %s1307_s24, %s1307_s24 }
 0x122   :  { %726 = vmatprep.mubr.f32.mxu1 %v1330_v23 }
 0x123   :  { %v782_v11 = vpop.permute.xlu0 %781  ;;  %p1314_p3 = por %p1313_p2, %p1312_p1 }
 0x124   :  { %1206 = vmatmul.mubr.msk.f32.gmra.mxu0 %vm554_vm1, %v527_v13 }
 0x125   :  { %1210 = vmatmul.mubr.msk.f32.gmra.mxu1 %vm554_vm1, %v527_v13  ;;  %643 = vmatprep.mubr.f32.mxu0 %v1330_v23  ;;  %p1315_p4 = pnand %p1314_p3, %p1308_p0 }
 0x126   :  { %732 = vmatprep.mubr.f32.mxu1 %v1330_v23 }
 0x128   :  { %1207 = vmatmul.mubr.msk.f32.gmra.mxu0 %vm554_vm1, %v528_v14 }
 0x129   :  { %1211 = vmatmul.mubr.msk.f32.gmra.mxu1 %vm554_vm1, %v528_v14  ;;  %649 = vmatprep.mubr.f32.mxu0 %v1330_v23 }
 0x12a   :  { %738 = vmatprep.mubr.f32.mxu1 %v1330_v23 }
 0x12c   :  { %1208 = vmatmul.mubr.msk.f32.gmra.mxu0 %vm554_vm1, %v529_v15 }
 0x12d   :  { %1212 = vmatmul.mubr.msk.f32.gmra.mxu1 %vm554_vm1, %v529_v15  ;;  %865 = vmatprep.mubr.f32.mxu0 %v1330_v23 }
 0x12e   :  { %954 = vmatprep.mubr.f32.mxu1 %v1330_v23 }
 0x1e0   :  { %v633_v16 = vpop.f32.mrf.mxu0 }
 0x1e1   :  { %v722_v17 = vpop.f32.mrf.mxu1  ;;  %v634_v57 = vadd.f32 %v633_v16, %v537_v48 }
 0x1e2   :  { %v635_v18 = vpop.f32.mrf.mxu0  ;;  %v723_v58 = vadd.f32 %v722_v17, %v537_v48 }
 0x1e3   :  { %v724_v19 = vpop.f32.mrf.mxu1  ;;  %v636_v53 = vadd.f32 %v635_v18, %v537_v48  ;;  %v745_v3 = vmax.f32 %v634_v57, 0.0  ;;  %v787_v18 = vpop.permute.xlu1 %786 }
 0x1e4   :  { %v639_v20 = vpop.f32.mrf.mxu0  ;;  %v725_v54 = vadd.f32 %v724_v19, %v537_v48  ;;  %v747_v4 = vmax.f32 %v723_v58, 0.0 }
 0x1e5   :  { %v728_v21 = vpop.f32.mrf.mxu1  ;;  %v640_v49 = vadd.f32 %v639_v20, %v542_v41  ;;  %v746_v1 = vmax.f32 %v636_v53, 0.0 }
 0x1e6   :  { %v641_v22 = vpop.f32.mrf.mxu0  ;;  %v729_v50 = vadd.f32 %v728_v21, %v542_v41  ;;  %v748_v2 = vmax.f32 %v725_v54, 0.0 }
 0x1e7   :  { %v730_v24 = vpop.f32.mrf.mxu1  ;;  %v642_v44 = vadd.f32 %v641_v22, %v542_v41  ;;  %v749_v63 = vmax.f32 %v640_v49, 0.0  ;;  %v1002_v22 = vpop.permute.xlu0 %1001 }
 0x1e8   :  { %v645_v25 = vpop.f32.mrf.mxu0  ;;  %v731_v45 = vadd.f32 %v730_v24, %v542_v41  ;;  %v751_v0 = vmax.f32 %v729_v50, 0.0 }
 0x1e9   :  { %v734_v26 = vpop.f32.mrf.mxu1  ;;  %v646_v42 = vadd.f32 %v645_v25, %v547_v30  ;;  %v750_v61 = vmax.f32 %v642_v44, 0.0 }
 0x1ea   :  { %v647_v28 = vpop.f32.mrf.mxu0  ;;  %v735_v43 = vadd.f32 %v734_v26, %v547_v30  ;;  %v752_v62 = vmax.f32 %v731_v45, 0.0 }
 0x1eb   :  { %v736_v29 = vpop.f32.mrf.mxu1  ;;  %v648_v37 = vadd.f32 %v647_v28, %v547_v30  ;;  %v753_v59 = vmax.f32 %v646_v42, 0.0 }
 0x1ec   :  { %v651_v31 = vpop.f32.mrf.mxu0  ;;  %v737_v38 = vadd.f32 %v736_v29, %v547_v30  ;;  %v755_v60 = vmax.f32 %v735_v43, 0.0 }
 0x1ed   :  { %v740_v32 = vpop.f32.mrf.mxu1  ;;  %v652_v33 = vadd.f32 %v651_v31, %v552_v27  ;;  %v754_v55 = vmax.f32 %v648_v37, 0.0 }
 0x1ee   :  { %v741_v34 = vadd.f32 %v740_v32, %v552_v27  ;;  %v653_v35 = vpop.f32.mrf.mxu0  ;;  %v756_v56 = vmax.f32 %v737_v38, 0.0  ;;  %v1007_v38 = vpop.permute.xlu1 %1006 }
 0x1ef   :  { %v742_v36 = vpop.f32.mrf.mxu1  ;;  %v654_v39 = vadd.f32 %v653_v35, %v552_v27  ;;  %v757_v51 = vmax.f32 %v652_v33, 0.0 }
 0x1f0   :  { %v743_v40 = vadd.f32 %v742_v36, %v552_v27  ;;  %v759_v52 = vmax.f32 %v741_v34, 0.0 }
 0x1f1   :  { %v758_v46 = vmax.f32 %v654_v39, 0.0 }
 0x1f2   :  { %v760_v47 = vmax.f32 %v743_v40, 0.0 }
 0x1f3   :  { %825 = vmatprep.subr.mxu0 %v758_v46 }
 0x1f4   :  { %914 = vmatprep.subr.mxu1 %v760_v47  ;;  %826 = vmatpush1.msra.mxu0 %v757_v51  ;;  %v1012_v47 = vpop.permute.xlu0 %1011 }
 0x1f5   :  { %915 = vmatpush1.msra.mxu1 %v759_v52  ;;  %827 = vmatprep.subr.mxu0 %v754_v55 }
 0x1f6   :  { %916 = vmatprep.subr.mxu1 %v756_v56  ;;  %828 = vmatpush1.msra.mxu0 %v753_v59 }
 0x1f7   :  { %917 = vmatpush1.msra.mxu1 %v755_v60  ;;  %829 = vmatprep.subr.mxu0 %v750_v61 }
 0x1f8   :  { %918 = vmatprep.subr.mxu1 %v752_v62  ;;  %830 = vmatpush1.msra.mxu0 %v749_v63 }
 0x1f9   :  { %919 = vmatpush1.msra.mxu1 %v751_v0  ;;  %831 = vmatprep.subr.mxu0 %v746_v1 }
 0x1fa   :  { %920 = vmatprep.subr.mxu1 %v748_v2  ;;  %832 = vmatpush1.msra.mxu0 %v745_v3 }
 0x1fb   :  { %921 = vmatpush1.msra.mxu1 %v747_v4  ;;  %1213 = vmatmul.mubr.msk.f32.vlgmr.msra.gmra.mxu0 %vm554_vm1, %v761_v5 }
 0x1fc   :  { %1217 = vmatmul.mubr.msk.f32.vlgmr.msra.gmra.mxu1 %vm554_vm1, %v761_v5  ;;  %871 = vmatprep.mubr.f32.mxu0 %v1330_v23 }
 0x1fd   :  { %960 = vmatprep.mubr.f32.mxu1 %v1330_v23 }
 0x1ff   :  { %1214 = vmatmul.mubr.msk.f32.gmra.mxu0 %vm554_vm1, %v762_v6 }
 0x200   :  { %1218 = vmatmul.mubr.msk.f32.gmra.mxu1 %vm554_vm1, %v762_v6  ;;  %877 = vmatprep.mubr.f32.mxu0 %v1330_v23 }
 0x201   :  { %966 = vmatprep.mubr.f32.mxu1 %v1330_v23 }
 0x203   :  { %1215 = vmatmul.mubr.msk.f32.gmra.mxu0 %vm554_vm1, %v763_v7 }
 0x204   :  { %1219 = vmatmul.mubr.msk.f32.gmra.mxu1 %vm554_vm1, %v763_v7  ;;  %883 = vmatprep.mubr.f32.mxu0 %v1330_v23 }
 0x205   :  { %972 = vmatprep.mubr.f32.mxu1 %v1330_v23 }
 0x207   :  { %1216 = vmatmul.mubr.msk.f32.gmra.mxu0 %vm554_vm1, %v764_v8 }
 0x208   :  { %1220 = vmatmul.mubr.msk.f32.gmra.mxu1 %vm554_vm1, %v764_v8 }
 0x2bb   :  { %v867_v12 = vpop.f32.mrf.mxu0 }
 0x2bc   :  { %v956_v13 = vpop.f32.mrf.mxu1  ;;  %v868_v14 = vadd.f32 %v867_v12, %v772_v9  ;;  %v1017_v12 = vpop.permute.xlu1 %1016 }
 0x2bd   :  { %v957_v15 = vadd.f32 %v956_v13, %v772_v9  ;;  %v869_v16 = vpop.f32.mrf.mxu0 }
 0x2be   :  { %v958_v17 = vpop.f32.mrf.mxu1  ;;  %v870_v19 = vadd.f32 %v869_v16, %v772_v9  ;;  %v979_v24 = vmax.f32 %v868_v14, 0.0 }
 0x2bf   :  { %v959_v23 = vadd.f32 %v958_v17, %v772_v9  ;;  %v873_v20 = vpop.f32.mrf.mxu0  ;;  %v981_v25 = vmax.f32 %v957_v15, 0.0 }
 0x2c0   :  { %v962_v21 = vpop.f32.mrf.mxu1  ;;  %v874_v26 = vadd.f32 %v873_v20, %v777_v10  ;;  %v980_v32 = vmax.f32 %v870_v19, 0.0  ;;  %v1019_v43 = vmul.f32 %v1002_v22, %v979_v24 }
 0x2c1   :  { %v963_v27 = vadd.f32 %v962_v21, %v777_v10  ;;  %v875_v28 = vpop.f32.mrf.mxu0  ;;  %v982_v33 = vmax.f32 %v959_v23, 0.0  ;;  %v1021_v44 = vmul.f32 %v1002_v22, %v981_v25 }
 0x2c2   :  { %v964_v29 = vpop.f32.mrf.mxu1  ;;  %v876_v30 = vadd.f32 %v875_v28, %v777_v10  ;;  %v983_v34 = vmax.f32 %v874_v26, 0.0  ;;  %v1020_v52 = vmul.f32 %v1002_v22, %v980_v32 }
 0x2c3   :  { %v965_v31 = vadd.f32 %v964_v29, %v777_v10  ;;  %v985_v35 = vmax.f32 %v963_v27, 0.0  ;;  %v879_v36 = vpop.f32.mrf.mxu0  ;;  %v1022_v53 = vmul.f32 %v1002_v22, %v982_v33 }
 0x2c4   :  { %v968_v37 = vpop.f32.mrf.mxu1  ;;  %v984_v39 = vmax.f32 %v876_v30, 0.0  ;;  %v880_v41 = vadd.f32 %v879_v36, %v782_v11  ;;  %v1023_v48 = vmul.f32 %v1007_v38, %v983_v34 }
 0x2c5   :  { %v986_v40 = vmax.f32 %v965_v31, 0.0  ;;  %v969_v42 = vadd.f32 %v968_v37, %v782_v11  ;;  %v881_v45 = vpop.f32.mrf.mxu0  ;;  %v1025_v49 = vmul.f32 %v1007_v38, %v985_v35 }
 0x2c6   :  { %v970_v46 = vpop.f32.mrf.mxu1  ;;  %v987_v50 = vmax.f32 %v880_v41, 0.0  ;;  %v882_v54 = vadd.f32 %v881_v45, %v782_v11  ;;  %v1024_v58 = vmul.f32 %v1007_v38, %v984_v39  ;;  %v1035_v4 = vadd.f32 %v1023_v48, %v1019_v43 }
 0x2c7   :  { %v989_v51 = vmax.f32 %v969_v42, 0.0  ;;  %v971_v55 = vadd.f32 %v970_v46, %v782_v11  ;;  %v885_v56 = vpop.f32.mrf.mxu0  ;;  %v1026_v59 = vmul.f32 %v1007_v38, %v986_v40  ;;  %v1053_v5 = vadd.f32 %v1025_v49, %v1021_v44 }
 0x2c8   :  { %v974_v57 = vpop.f32.mrf.mxu1  ;;  %v1027_v60 = vmul.f32 %v1012_v47, %v987_v50  ;;  %v988_v62 = vmax.f32 %v882_v54, 0.0  ;;  %v886_v0 = vadd.f32 %v885_v56, %v787_v18  ;;  %v1044_v13 = vadd.f32 %v1024_v58, %v1020_v52 }
 0x2c9   :  { %v1029_v61 = vmul.f32 %v1012_v47, %v989_v51  ;;  %v990_v63 = vmax.f32 %v971_v55, 0.0  ;;  %v975_v1 = vadd.f32 %v974_v57, %v787_v18  ;;  %v887_v2 = vpop.f32.mrf.mxu0  ;;  %v1062_v14 = vadd.f32 %v1026_v59, %v1022_v53  ;;  %v1075_v51 = vpop.permute.xlu0 %1074 }
 0x2ca   :  { %v976_v3 = vpop.f32.mrf.mxu1  ;;  %v888_v6 = vadd.f32 %v887_v2, %v787_v18  ;;  %v1028_v8 = vmul.f32 %v1012_v47, %v988_v62  ;;  %v991_v10 = vmax.f32 %v886_v0, 0.0  ;;  %v1036_v17 = vadd.f32 %v1035_v4, %v1027_v60 }
 0x2cb   :  { %v977_v7 = vadd.f32 %v976_v3, %v787_v18  ;;  %v1030_v9 = vmul.f32 %v1012_v47, %v990_v63  ;;  %v993_v11 = vmax.f32 %v975_v1, 0.0  ;;  %v1054_v19 = vadd.f32 %v1053_v5, %v1029_v61 }
 0x2cc   :  { %v992_v15 = vmax.f32 %v888_v6, 0.0  ;;  %v1031_v23 = vmul.f32 %v1017_v12, %v991_v10  ;;  %v1045_v21 = vadd.f32 %v1044_v13, %v1028_v8  ;;  %v1077_v18 = vlaneseq }
 0x2cd   :  { %v994_v16 = vmax.f32 %v977_v7, 0.0  ;;  %v1033_v20 = vmul.f32 %v1017_v12, %v993_v11  ;;  %v1063_v22 = vadd.f32 %v1062_v14, %v1030_v9  ;;  %v1331_v39 = vmov 1966171168  }
 0x2ce   :  { %v1032_v24 = vmul.f32 %v1017_v12, %v992_v15  ;;  %v1037_v26 = vadd.f32 %v1036_v17, %v1031_v23  ;;  %v1078_v36 = vshrl.u32 %v1077_v18, 7  ;;  %v1092_v40 = vunpack.c.l.s4 %v1331_v39 }
 0x2cf   :  { %v1034_v25 = vmul.f32 %v1017_v12, %v994_v16  ;;  %v1055_v27 = vadd.f32 %v1054_v19, %v1033_v20  ;;  %vm1116_vm2 = vcmp.lt.s32.totalorder %v1077_v18, 512 }
 0x2d0   :  { %v1046_v28 = vadd.f32 %v1045_v21, %v1032_v24  ;;  %v1038_v30 = vrot.slane %v1037_v26, 4  ;;  %v1079_v47 = vsub.s32 0, %v1078_v36  ;;  %v1093_v50 = vunpack.c.0.s8 %v1092_v40 }
 0x2d1   :  { %v1064_v29 = vadd.f32 %v1063_v22, %v1034_v25  ;;  %v1056_v31 = vrot.slane %v1055_v27, 4 }
 0x2d2   :  { %v1047_v32 = vrot.slane %v1046_v28, 4  ;;  %v1039_v34 = vadd.f32 %v1038_v30, %v1037_v26  ;;  %v1080_v58 = vrot.slane %v1075_v51, %v1079_v47  ;;  %v1096_v61 = vsub.s32 %v1093_v50, %v1078_v36 }
 0x2d3   :  { %v1065_v33 = vrot.slane %v1064_v29, 4  ;;  %v1057_v35 = vadd.f32 %v1056_v31, %v1055_v27 }
 0x2d4   :  { %v1048_v37 = vadd.f32 %v1047_v32, %v1046_v28  ;;  %v1040_v41 = vrot.slane %v1039_v34, 2 }
 0x2d5   :  { %v1066_v38 = vadd.f32 %v1065_v33, %v1064_v29  ;;  %v1058_v42 = vrot.slane %v1057_v35, 2 }
 0x2d6   :  { %v1049_v43 = vrot.slane %v1048_v37, 2  ;;  %v1041_v45 = vadd.f32 %v1040_v41, %v1039_v34 }
 0x2d7   :  { %v1067_v44 = vrot.slane %v1066_v38, 2  ;;  %v1059_v46 = vadd.f32 %v1058_v42, %v1057_v35 }
 0x2d8   :  { %v1050_v48 = vadd.f32 %v1049_v43, %v1048_v37  ;;  %v1042_v52 = vrot.slane %v1041_v45, 1 }
 0x2d9   :  { %v1068_v49 = vadd.f32 %v1067_v44, %v1066_v38  ;;  %v1060_v53 = vrot.slane %v1059_v46, 1 }
 0x2da   :  { %v1051_v54 = vrot.slane %v1050_v48, 1  ;;  %v1043_v56 = vadd.f32 %v1042_v52, %v1041_v45 }
 0x2db   :  { %v1069_v55 = vrot.slane %v1068_v49, 1  ;;  %v1061_v57 = vadd.f32 %v1060_v53, %v1059_v46 }
 0x2dc   :  { %v1052_v59 = vadd.f32 %v1051_v54, %v1050_v48  ;;  %v1081_v62 = vadd.f32 %v1080_v58, %v1043_v56 }
 0x2dd   :  { %v1070_v60 = vadd.f32 %v1069_v55, %v1068_v49  ;;  %v1083_v0 = vadd.f32 %v1080_v58, %v1061_v57 }
 0x2de   :  { %v1082_v63 = vadd.f32 %v1080_v58, %v1052_v59 }
 0x2df   :  { %v1084_v1 = vadd.f32 %v1080_v58, %v1070_v60 }
 0x2e0   :  { %v1089_v2 = vcombine.low %v1081_v62, %v1082_v63 }
 0x2e1   :  { %v1090_v3 = vcombine.low %v1083_v0, %v1084_v1 }
 0x2e2   :  { %v1097_v4 = vrot.slane %v1089_v2, %v1096_v61 }
 0x2e3   :  { %v1104_v5 = vrot.slane %v1090_v3, %v1096_v61 }
 0x2e5   :  { %v1105_v6 = vcombine.low %v1097_v4, %v1104_v5 }
 0x2e7   :  { %v1112_v7 = vrot.slane %v1105_v6, %v1096_v61 }
 0x2e9   :  { %1118 = vst.msk [vmem:[#allocation3] sm:$0xf] %vm1116_vm2, %v1112_v7 }
 0x2ea   :  { %1318 = shalt.err (!%p1315_p4)
}
 0x2eb   :  { %1128 = dma.vmem_to_hbm [thread:$0]  %s1126_s23, 64, %s1792_s9, [#allocation4]  }
 0x2ec   :  { %1327 = dma.done.wait [#allocation4], 64  }
 0x2ed   :  { %1328 = vsyncadd [#allocation4], 4294967232 }
 0x2ee   :  { %1132 = vsyncpa [#allocation4], 1 }

</bundles_post_ra>
